<compile_context>
chip_gen: v6e
topology: v6e:2x2x1
jax: 0.10.0
libtpu: 0.0.40
codegen_flags: <defaults>
</compile_context>

<pallas_src>
import math
from functools import partial

import jax
import jax.numpy as jnp
from jax.experimental import pallas as pl
from jax.experimental.pallas import tpu as pltpu


# ----------------------------------------------------------------------------
# Kernel 1: implicit filter MLP  (computed once; tiny)
# ----------------------------------------------------------------------------
def _filter_mlp_kernel(z_ref, w1_ref, b1_ref, w2_ref, b2_ref, filt_ref):
    h = jnp.dot(z_ref[...], w1_ref[...],
                preferred_element_type=jnp.float32) + b1_ref[...]
    h = jnp.maximum(h, 0.0)
    filt_ref[...] = (jnp.dot(h, w2_ref[...],
                             preferred_element_type=jnp.float32) + b2_ref[...])


# ----------------------------------------------------------------------------
# Kernel 2: causal depthwise conv + projection gating + residual
#   grid = (B, n_pairs); pair p -> (qi, dj) via scalar-prefetch SMEM tables.
#   For each output time tile qi the lag tiles run dj = qi .. 0, so the final
#   step (dj == 0) holds the output tile of u and fuses projection / gating /
#   residual.
# ----------------------------------------------------------------------------
def _conv_kernel(qi_ref, dj_ref, u_hi_ref, u_lo_ref, filt_ref, wp_ref, bp_ref,
                 out_ref, acc_ref, rot_ref):
    T = acc_ref.shape[0]
    p = pl.program_id(1)
    qi = qi_ref[p]                      # output time-tile index
    dj = dj_ref[p]                      # lag-tile index (qi -> 0 within a group)

    @pl.when(dj == qi)                  # first lag tile of this output tile
    def _init():
        acc_ref[...] = jnp.zeros_like(acc_ref)

    # ---- depthwise causal conv contribution of lag tile dj --------------
    u_hi = u_hi_ref[0]                                    # u block (qi - dj)
    u_lo = jnp.where(dj < qi, u_lo_ref[0],                # u block (qi - dj - 1)
                     jnp.zeros_like(u_hi))                # zero-extend t < 0
    # window covers absolute times [(qi-dj-1)*T, (qi-dj+1)*T)
    window = jnp.concatenate([u_lo, u_hi], axis=0)        # (2T, D)
    filt = filt_ref[...]                                  # lags [dj*T, (dj+1)*T)
    acc = acc_ref[...]
    for r in range(8):                  # 8 sub-lag phases -> only 8 rolls total
        if r == 0:
            rot_ref[...] = window                         # rot[i] = window[i]
        else:
            # rot[i] = window[i - r]; rows i < 8 are never read below.
            rot_ref[...] = pltpu.roll(rot_ref[...], shift=1, axis=0)
        for a in range(T // 8):         # static unroll; all slices 8-aligned
            dl = 8 * a + r
            # y[qi*T + t] += u[qi*T + t - (dj*T + dl)] * k[dj*T + dl]
            shifted = rot_ref[T - 8 * a:2 * T - 8 * a, :]  # (T, D), aligned
            acc = acc + shifted * filt[dl:dl + 1, :]
    acc_ref[...] = acc                  # single VMEM writeback per grid step

    @pl.when(dj == 0)                   # u_hi is the output u tile here
    def _finalize():
        proj = (jnp.dot(u_hi, wp_ref[...], preferred_element_type=jnp.float32)
                + bp_ref[...])
        out_ref[0] = (acc * proj + u_hi).astype(out_ref.dtype)


# ----------------------------------------------------------------------------
# Wrapper
# ----------------------------------------------------------------------------
@partial(jax.jit, static_argnames=("block_t",))
def implicit_conv_forward(u, z, w1, b1, w2, b2, wp, bp, *, block_t=128):
    B, L, D = u.shape
    E = z.shape[1]
    H = w1.shape[1]
    T = min(block_t, L)
    assert L % T == 0 and T % 8 == 0, "time tile must divide L and be 8-aligned"
    nt = L // T                          # number of time tiles == lag tiles

    # --- 1) implicit filter: computed once --------------------------------
    filt = pl.pallas_call(
        _filter_mlp_kernel,
        out_shape=jax.ShapeDtypeStruct((L, D), jnp.float32),
        grid_spec=pltpu.PrefetchScalarGridSpec(
            num_scalar_prefetch=0, grid=(nt,),
            in_specs=[pl.BlockSpec((T, E), lambda i: (i, 0)),
                      pl.BlockSpec((E, H), lambda i: (0, 0)),
                      pl.BlockSpec((1, H), lambda i: (0, 0)),
                      pl.BlockSpec((H, D), lambda i: (0, 0)),
                      pl.BlockSpec((1, D), lambda i: (0, 0))],
            out_specs=pl.BlockSpec((T, D), lambda i: (i, 0))),
        compiler_params=pltpu.CompilerParams(
            dimension_semantics=("parallel",)),
    )(z, w1, b1, w2, b2)

    # --- 2) triangular (output tile, lag tile) schedule -------------------
    qi_list, dj_list = [], []
    for qi in range(nt):
        for dj in range(qi, -1, -1):     # lag tiles high -> low; dj == 0 last
            qi_list.append(qi)
            dj_list.append(dj)
    n_pairs = len(qi_list)
    qi_arr = jnp.asarray(qi_list, dtype=jnp.int32)
    dj_arr = jnp.asarray(dj_list, dtype=jnp.int32)

    def u_hi_map(b, p, qi, dj):
        return (b, qi[p] - dj[p], 0)

    def u_lo_map(b, p, qi, dj):
        return (b, jnp.maximum(qi[p] - dj[p] - 1, 0), 0)

    def filt_map(b, p, qi, dj):
        return (dj[p], 0)

    def out_map(b, p, qi, dj):
        return (b, qi[p], 0)

    out = pl.pallas_call(
        _conv_kernel,
        out_shape=jax.ShapeDtypeStruct((B, L, D), u.dtype),
        grid_spec=pltpu.PrefetchScalarGridSpec(
            num_scalar_prefetch=2, grid=(B, n_pairs),
            in_specs=[pl.BlockSpec((1, T, D), u_hi_map),
                      pl.BlockSpec((1, T, D), u_lo_map),
                      pl.BlockSpec((T, D), filt_map),
                      pl.BlockSpec((D, D), lambda b, p, qi, dj: (0, 0)),
                      pl.BlockSpec((1, D), lambda b, p, qi, dj: (0, 0))],
            out_specs=pl.BlockSpec((1, T, D), out_map),
            scratch_shapes=[pltpu.VMEM((T, D), jnp.float32),
                            pltpu.VMEM((2 * T, D), jnp.float32)]),
        compiler_params=pltpu.CompilerParams(
            dimension_semantics=("parallel", "arbitrary")),
    )(qi_arr, dj_arr, u, u, filt, wp, bp)
    return out


# ----------------------------------------------------------------------------
# Parameter / positional-embedding construction (plain-JAX glue)
# ----------------------------------------------------------------------------
def make_positional_embedding(d_emb, seq_len):
    """Matches PositionalEmbedding.__init__ (returns (seq_len, d_emb))."""
    t = jnp.linspace(0.0, 1.0, seq_len)[:, None]                 # (L, 1)
    bands = (d_emb - 1) // 2
    t_rescaled = jnp.linspace(0.0, seq_len - 1, seq_len)[:, None]
    w = 2.0 * math.pi * t_rescaled / seq_len                     # (L, 1)
    f = jnp.linspace(1e-4, float(bands - 1), bands)[None, :]     # (1, bands)
    ang = f * w                                                  # (L, bands)
    # exp(-i*ang) = cos(ang) - i*sin(ang)
    z = jnp.concatenate([t, jnp.cos(ang), -jnp.sin(ang)], axis=-1)
    return z.astype(jnp.float32)                                 # (L, d_emb)


def make_params(key, d_model, d_emb, d_hidden):
    ks = jax.random.split(key, 6)
    w1 = jax.random.normal(ks[0], (d_emb, d_hidden), jnp.float32) / math.sqrt(d_emb)
    b1 = jax.random.normal(ks[1], (1, d_hidden), jnp.float32) * 0.01
    w2 = jax.random.normal(ks[2], (d_hidden, d_model), jnp.float32) / math.sqrt(d_hidden)
    b2 = jax.random.normal(ks[3], (1, d_model), jnp.float32) * 0.01
    wp = jax.random.normal(ks[4], (d_model, d_model), jnp.float32) / math.sqrt(d_model)
    bp = jax.random.normal(ks[5], (1, d_model), jnp.float32) * 0.01
    return w1, b1, w2, b2, wp, bp


# ----------------------------------------------------------------------------
# Pure-JAX reference (mirrors the PyTorch fft_conv path).
# ----------------------------------------------------------------------------
def reference_forward(u, z, w1, b1, w2, b2, wp, bp):
    L = u.shape[1]
    h = jnp.maximum(z @ w1 + b1, 0.0)
    filt = h @ w2 + b2                        # (L, D)
    k = filt.T                                # (D, L)
    ut = jnp.transpose(u, (0, 2, 1))          # (B, D, L)
    n = 2 * L
    k_f = jnp.fft.rfft(k, n=n) / n
    u_f = jnp.fft.rfft(ut, n=n)
    # torch.fft.irfft(..., norm='forward') applies NO 1/n; jnp default does -> *n
    y = jnp.fft.irfft(u_f * k_f, n=n) * n
    u_conv = jnp.transpose(y[..., :L], (0, 2, 1))
    u_proj = jnp.dot(u, wp, preferred_element_type=jnp.float32) + bp
    return u_conv * u_proj + u


if __name__ == "__main__":
    # small shapes consistent with the module; d_model chosen lane-dense (128)
    B, L, D = 2, 16, 128          # batch, seq_len (= l_max), d_model
    d_emb, d_hidden = 3, 16

    key = jax.random.PRNGKey(0)
    k_u, k_p = jax.random.split(key)
    u = jax.random.normal(k_u, (B, L, D), jnp.float32)

    z = make_positional_embedding(d_emb, L)                      # (L, 3)
    w1, b1, w2, b2, wp, bp = make_params(k_p, D, d_emb, d_hidden)

    # block_t=8 so the tiny test exercises multi-tile (diagonal + off-diagonal)
    # paths and all 8 sub-lag phases; real l_max would use block_t=128.
    y = implicit_conv_forward(u, z, w1, b1, w2, b2, wp, bp, block_t=8)
    y = jax.block_until_ready(y)

    y_ref = reference_forward(u, z, w1, b1, w2, b2, wp, bp)
    assert y.shape == (B, L, D)
    err = jnp.max(jnp.abs(y - y_ref))
    assert jnp.allclose(y, y_ref, atol=1e-2, rtol=1e-2), f"max abs err {err}"

    print("KERNEL_OK")
</pallas_src>

<mosaic_0001>
module attributes {stable_mosaic.version = 11 : i64} {
  func.func @_filter_mlp_kernel(%arg0: i32, %arg1: memref<8x3xf32, #tpu.memory_space<vmem>>, %arg2: memref<3x16xf32, #tpu.memory_space<vmem>>, %arg3: memref<1x16xf32, #tpu.memory_space<vmem>>, %arg4: memref<16x128xf32, #tpu.memory_space<vmem>>, %arg5: memref<1x128xf32, #tpu.memory_space<vmem>>, %arg6: memref<8x128xf32, #tpu.memory_space<vmem>>) attributes {dimension_semantics = [#tpu.dimension_semantics<parallel>], iteration_bounds = array<i64: 2>, scalar_prefetch = 0 : i64, scratch_operands = 0 : i64, tpu.core_type = #tpu.core_type<tc>, window_params = [{transform_indices = @transform_0, window_bounds = array<i64: 8, 3>}, {pipeline_mode = #tpu.pipeline_mode<synchronous>, transform_indices = @transform_1, window_bounds = array<i64: 3, 16>}, {pipeline_mode = #tpu.pipeline_mode<synchronous>, transform_indices = @transform_2, window_bounds = array<i64: 1, 16>}, {pipeline_mode = #tpu.pipeline_mode<synchronous>, transform_indices = @transform_3, window_bounds = array<i64: 16, 128>}, {pipeline_mode = #tpu.pipeline_mode<synchronous>, transform_indices = @transform_4, window_bounds = array<i64: 1, 128>}, {transform_indices = @transform_5, window_bounds = array<i64: 8, 128>}]} {
    %c0 = arith.constant 0 : index
    %c0_0 = arith.constant 0 : index
    %0 = vector.load %arg1[%c0, %c0_0] : memref<8x3xf32, #tpu.memory_space<vmem>>, vector<8x3xf32>
    %c0_1 = arith.constant 0 : index
    %c0_2 = arith.constant 0 : index
    %1 = vector.load %arg2[%c0_1, %c0_2] : memref<3x16xf32, #tpu.memory_space<vmem>>, vector<3x16xf32>
    %cst = arith.constant dense<0.000000e+00> : vector<8x16xf32>
    %2 = tpu.matmul %0, %1, %cst {dimension_numbers = #tpu.dot_dimension_numbers<[1], [0], [0], [1], [0, 0, 1, 1], [], []>} : vector<8x3xf32>, vector<3x16xf32>, vector<8x16xf32> -> vector<8x16xf32>
    %c0_3 = arith.constant 0 : index
    %c0_4 = arith.constant 0 : index
    %3 = vector.load %arg3[%c0_3, %c0_4] : memref<1x16xf32, #tpu.memory_space<vmem>>, vector<1x16xf32>
    %4 = vector.broadcast %3 : vector<1x16xf32> to vector<8x16xf32>
    %5 = arith.addf %2, %4 : vector<8x16xf32>
    %cst_5 = arith.constant 0.000000e+00 : f32
    %6 = vector.broadcast %cst_5 : f32 to vector<8x16xf32>
    %7 = arith.maximumf %5, %6 : vector<8x16xf32>
    %c0_6 = arith.constant 0 : index
    %c0_7 = arith.constant 0 : index
    %8 = vector.load %arg4[%c0_6, %c0_7] : memref<16x128xf32, #tpu.memory_space<vmem>>, vector<16x128xf32>
    %cst_8 = arith.constant dense<0.000000e+00> : vector<8x128xf32>
    %9 = tpu.matmul %7, %8, %cst_8 {dimension_numbers = #tpu.dot_dimension_numbers<[1], [0], [0], [1], [0, 0, 1, 1], [], []>} : vector<8x16xf32>, vector<16x128xf32>, vector<8x128xf32> -> vector<8x128xf32>
    %c0_9 = arith.constant 0 : index
    %c0_10 = arith.constant 0 : index
    %10 = vector.load %arg5[%c0_9, %c0_10] : memref<1x128xf32, #tpu.memory_space<vmem>>, vector<1x128xf32>
    %11 = vector.broadcast %10 : vector<1x128xf32> to vector<8x128xf32>
    %12 = arith.addf %9, %11 : vector<8x128xf32>
    %c0_11 = arith.constant 0 : index
    %c0_12 = arith.constant 0 : index
    %13 = vector.load %arg6[%c0_11, %c0_12] : memref<8x128xf32, #tpu.memory_space<vmem>>, vector<8x128xf32>
    tpu.vector_store %arg6[%c0_11, %c0_12], %12 {strides = array<i32>} : memref<8x128xf32, #tpu.memory_space<vmem>>, vector<8x128xf32>,
    return
  }
  func.func @transform_0(%arg0: i32) -> (i32, i32) {
    %c0_i32 = arith.constant 0 : i32
    %c0_i32_0 = arith.constant 0 : i32
    return %arg0, %c0_i32 : i32, i32
  }
  func.func @transform_1(%arg0: i32) -> (i32, i32) {
    %c0_i32 = arith.constant 0 : i32
    %c0_i32_0 = arith.constant 0 : i32
    %c0_i32_1 = arith.constant 0 : i32
    return %c0_i32, %c0_i32_0 : i32, i32
  }
  func.func @transform_2(%arg0: i32) -> (i32, i32) {
    %c0_i32 = arith.constant 0 : i32
    %c0_i32_0 = arith.constant 0 : i32
    %c0_i32_1 = arith.constant 0 : i32
    return %c0_i32, %c0_i32_0 : i32, i32
  }
  func.func @transform_3(%arg0: i32) -> (i32, i32) {
    %c0_i32 = arith.constant 0 : i32
    %c0_i32_0 = arith.constant 0 : i32
    %c0_i32_1 = arith.constant 0 : i32
    return %c0_i32, %c0_i32_0 : i32, i32
  }
  func.func @transform_4(%arg0: i32) -> (i32, i32) {
    %c0_i32 = arith.constant 0 : i32
    %c0_i32_0 = arith.constant 0 : i32
    %c0_i32_1 = arith.constant 0 : i32
    return %c0_i32, %c0_i32_0 : i32, i32
  }
  func.func @transform_5(%arg0: i32) -> (i32, i32) {
    %c0_i32 = arith.constant 0 : i32
    %c0_i32_0 = arith.constant 0 : i32
    return %arg0, %c0_i32 : i32, i32
  }
}

module attributes {stable_mosaic.version = 11 : i64} {
  func.func @_conv_kernel(%arg0: i32, %arg1: i32, %arg2: memref<3xi32, #tpu.memory_space<smem>>, %arg3: memref<3xi32, #tpu.memory_space<smem>>, %arg4: memref<1x8x128xf32, #tpu.memory_space<vmem>>, %arg5: memref<1x8x128xf32, #tpu.memory_space<vmem>>, %arg6: memref<8x128xf32, #tpu.memory_space<vmem>>, %arg7: memref<128x128xf32, #tpu.memory_space<vmem>>, %arg8: memref<1x128xf32, #tpu.memory_space<vmem>>, %arg9: memref<1x8x128xf32, #tpu.memory_space<vmem>>, %arg10: memref<8x128xf32, #tpu.memory_space<vmem>>, %arg11: memref<16x128xf32, #tpu.memory_space<vmem>>) attributes {dimension_semantics = [#tpu.dimension_semantics<parallel>, #tpu.dimension_semantics<arbitrary>], iteration_bounds = array<i64: 2, 3>, scalar_prefetch = 2 : i64, scratch_operands = 2 : i64, tpu.core_type = #tpu.core_type<tc>, window_params = [{transform_indices = @transform_0, window_bounds = array<i64: 1, 8, 128>}, {transform_indices = @transform_1, window_bounds = array<i64: 1, 8, 128>}, {transform_indices = @transform_2, window_bounds = array<i64: 8, 128>}, {pipeline_mode = #tpu.pipeline_mode<synchronous>, transform_indices = @transform_3, window_bounds = array<i64: 128, 128>}, {pipeline_mode = #tpu.pipeline_mode<synchronous>, transform_indices = @transform_4, window_bounds = array<i64: 1, 128>}, {transform_indices = @transform_5, window_bounds = array<i64: 1, 8, 128>}]} {
    %0 = arith.index_cast %arg1 : i32 to index
    %1 = memref.load %arg2[%0] : memref<3xi32, #tpu.memory_space<smem>>
    %2 = arith.index_cast %arg1 : i32 to index
    %3 = memref.load %arg3[%2] : memref<3xi32, #tpu.memory_space<smem>>
    %4 = arith.cmpi eq, %3, %1 : i32
    %5 = arith.extui %4 : i1 to i32
    %c0_i32 = arith.constant 0 : i32
    %6 = arith.cmpi ne, %5, %c0_i32 : i32
    scf.if %6 {
      %cst_64 = arith.constant 0.000000e+00 : f32
      %83 = vector.broadcast %cst_64 : f32 to vector<8x128xf32>
      %c0_65 = arith.constant 0 : index
      %c0_66 = arith.constant 0 : index
      %84 = vector.load %arg10[%c0_65, %c0_66] : memref<8x128xf32, #tpu.memory_space<vmem>>, vector<8x128xf32>
      tpu.vector_store %arg10[%c0_65, %c0_66], %83 {strides = array<i32>} : memref<8x128xf32, #tpu.memory_space<vmem>>, vector<8x128xf32>,
    } else {
    }
    %c0 = arith.constant 0 : index
    %c0_0 = arith.constant 0 : index
    %c0_1 = arith.constant 0 : index
    %7 = vector.load %arg4[%c0, %c0_0, %c0_1] : memref<1x8x128xf32, #tpu.memory_space<vmem>>, vector<1x8x128xf32>
    %8 = vector.shape_cast %7 : vector<1x8x128xf32> to vector<8x128xf32>
    %9 = arith.cmpi slt, %3, %1 : i32
    %c0_2 = arith.constant 0 : index
    %c0_3 = arith.constant 0 : index
    %c0_4 = arith.constant 0 : index
    %10 = vector.load %arg5[%c0_2, %c0_3, %c0_4] : memref<1x8x128xf32, #tpu.memory_space<vmem>>, vector<1x8x128xf32>
    %11 = vector.shape_cast %10 : vector<1x8x128xf32> to vector<8x128xf32>
    %cst = arith.constant 0.000000e+00 : f32
    %12 = vector.broadcast %cst : f32 to vector<8x128xf32>
    %13 = arith.select %9, %11, %12 : vector<8x128xf32>
    %14 = tpu.concatenate %13, %8 in 0 : vector<8x128xf32>, vector<8x128xf32> -> vector<16x128xf32>
    %c0_5 = arith.constant 0 : index
    %c0_6 = arith.constant 0 : index
    %15 = vector.load %arg6[%c0_5, %c0_6] : memref<8x128xf32, #tpu.memory_space<vmem>>, vector<8x128xf32>
    %c0_7 = arith.constant 0 : index
    %c0_8 = arith.constant 0 : index
    %16 = vector.load %arg10[%c0_7, %c0_8] : memref<8x128xf32, #tpu.memory_space<vmem>>, vector<8x128xf32>
    %c0_9 = arith.constant 0 : index
    %c0_10 = arith.constant 0 : index
    %17 = vector.load %arg11[%c0_9, %c0_10] : memref<16x128xf32, #tpu.memory_space<vmem>>, vector<16x128xf32>
    tpu.vector_store %arg11[%c0_9, %c0_10], %14 {strides = array<i32>} : memref<16x128xf32, #tpu.memory_space<vmem>>, vector<16x128xf32>,
    %c8 = arith.constant 8 : index
    %c0_11 = arith.constant 0 : index
    %18 = vector.load %arg11[%c8, %c0_11] : memref<16x128xf32, #tpu.memory_space<vmem>>, vector<8x128xf32>
    %19 = vector.extract_strided_slice %15 {offsets = [0, 0], sizes = [1, 128], strides = [1, 1]} : vector<8x128xf32> to vector<1x128xf32>
    %20 = vector.broadcast %19 : vector<1x128xf32> to vector<8x128xf32>
    %21 = arith.mulf %18, %20 : vector<8x128xf32>
    %22 = arith.addf %16, %21 : vector<8x128xf32>
    %c0_12 = arith.constant 0 : index
    %c0_13 = arith.constant 0 : index
    %23 = vector.load %arg11[%c0_12, %c0_13] : memref<16x128xf32, #tpu.memory_space<vmem>>, vector<16x128xf32>
    %c1_i32 = arith.constant 1 : i32
    %24 = tpu.dynamic_rotate %23 by %c1_i32 dim 0 : vector<16x128xf32>, i32 -> vector<16x128xf32>
    %c0_14 = arith.constant 0 : index
    %c0_15 = arith.constant 0 : index
    %25 = vector.load %arg11[%c0_14, %c0_15] : memref<16x128xf32, #tpu.memory_space<vmem>>, vector<16x128xf32>
    tpu.vector_store %arg11[%c0_14, %c0_15], %24 {strides = array<i32>} : memref<16x128xf32, #tpu.memory_space<vmem>>, vector<16x128xf32>,
    %c8_16 = arith.constant 8 : index
    %c0_17 = arith.constant 0 : index
    %26 = vector.load %arg11[%c8_16, %c0_17] : memref<16x128xf32, #tpu.memory_space<vmem>>, vector<8x128xf32>
    %27 = vector.extract_strided_slice %15 {offsets = [1, 0], sizes = [1, 128], strides = [1, 1]} : vector<8x128xf32> to vector<1x128xf32>
    %28 = vector.broadcast %27 : vector<1x128xf32> to vector<8x128xf32>
    %29 = arith.mulf %26, %28 : vector<8x128xf32>
    %30 = arith.addf %22, %29 : vector<8x128xf32>
    %c0_18 = arith.constant 0 : index
    %c0_19 = arith.constant 0 : index
    %31 = vector.load %arg11[%c0_18, %c0_19] : memref<16x128xf32, #tpu.memory_space<vmem>>, vector<16x128xf32>
    %c1_i32_20 = arith.constant 1 : i32
    %32 = tpu.dynamic_rotate %31 by %c1_i32_20 dim 0 : vector<16x128xf32>, i32 -> vector<16x128xf32>
    %c0_21 = arith.constant 0 : index
    %c0_22 = arith.constant 0 : index
    %33 = vector.load %arg11[%c0_21, %c0_22] : memref<16x128xf32, #tpu.memory_space<vmem>>, vector<16x128xf32>
    tpu.vector_store %arg11[%c0_21, %c0_22], %32 {strides = array<i32>} : memref<16x128xf32, #tpu.memory_space<vmem>>, vector<16x128xf32>,
    %c8_23 = arith.constant 8 : index
    %c0_24 = arith.constant 0 : index
    %34 = vector.load %arg11[%c8_23, %c0_24] : memref<16x128xf32, #tpu.memory_space<vmem>>, vector<8x128xf32>
    %35 = vector.extract_strided_slice %15 {offsets = [2, 0], sizes = [1, 128], strides = [1, 1]} : vector<8x128xf32> to vector<1x128xf32>
    %36 = vector.broadcast %35 : vector<1x128xf32> to vector<8x128xf32>
    %37 = arith.mulf %34, %36 : vector<8x128xf32>
    %38 = arith.addf %30, %37 : vector<8x128xf32>
    %c0_25 = arith.constant 0 : index
    %c0_26 = arith.constant 0 : index
    %39 = vector.load %arg11[%c0_25, %c0_26] : memref<16x128xf32, #tpu.memory_space<vmem>>, vector<16x128xf32>
    %c1_i32_27 = arith.constant 1 : i32
    %40 = tpu.dynamic_rotate %39 by %c1_i32_27 dim 0 : vector<16x128xf32>, i32 -> vector<16x128xf32>
    %c0_28 = arith.constant 0 : index
    %c0_29 = arith.constant 0 : index
    %41 = vector.load %arg11[%c0_28, %c0_29] : memref<16x128xf32, #tpu.memory_space<vmem>>, vector<16x128xf32>
    tpu.vector_store %arg11[%c0_28, %c0_29], %40 {strides = array<i32>} : memref<16x128xf32, #tpu.memory_space<vmem>>, vector<16x128xf32>,
    %c8_30 = arith.constant 8 : index
    %c0_31 = arith.constant 0 : index
    %42 = vector.load %arg11[%c8_30, %c0_31] : memref<16x128xf32, #tpu.memory_space<vmem>>, vector<8x128xf32>
    %43 = vector.extract_strided_slice %15 {offsets = [3, 0], sizes = [1, 128], strides = [1, 1]} : vector<8x128xf32> to vector<1x128xf32>
    %44 = vector.broadcast %43 : vector<1x128xf32> to vector<8x128xf32>
    %45 = arith.mulf %42, %44 : vector<8x128xf32>
    %46 = arith.addf %38, %45 : vector<8x128xf32>
    %c0_32 = arith.constant 0 : index
    %c0_33 = arith.constant 0 : index
    %47 = vector.load %arg11[%c0_32, %c0_33] : memref<16x128xf32, #tpu.memory_space<vmem>>, vector<16x128xf32>
    %c1_i32_34 = arith.constant 1 : i32
    %48 = tpu.dynamic_rotate %47 by %c1_i32_34 dim 0 : vector<16x128xf32>, i32 -> vector<16x128xf32>
    %c0_35 = arith.constant 0 : index
    %c0_36 = arith.constant 0 : index
    %49 = vector.load %arg11[%c0_35, %c0_36] : memref<16x128xf32, #tpu.memory_space<vmem>>, vector<16x128xf32>
    tpu.vector_store %arg11[%c0_35, %c0_36], %48 {strides = array<i32>} : memref<16x128xf32, #tpu.memory_space<vmem>>, vector<16x128xf32>,
    %c8_37 = arith.constant 8 : index
    %c0_38 = arith.constant 0 : index
    %50 = vector.load %arg11[%c8_37, %c0_38] : memref<16x128xf32, #tpu.memory_space<vmem>>, vector<8x128xf32>
    %51 = vector.extract_strided_slice %15 {offsets = [4, 0], sizes = [1, 128], strides = [1, 1]} : vector<8x128xf32> to vector<1x128xf32>
    %52 = vector.broadcast %51 : vector<1x128xf32> to vector<8x128xf32>
    %53 = arith.mulf %50, %52 : vector<8x128xf32>
    %54 = arith.addf %46, %53 : vector<8x128xf32>
    %c0_39 = arith.constant 0 : index
    %c0_40 = arith.constant 0 : index
    %55 = vector.load %arg11[%c0_39, %c0_40] : memref<16x128xf32, #tpu.memory_space<vmem>>, vector<16x128xf32>
    %c1_i32_41 = arith.constant 1 : i32
    %56 = tpu.dynamic_rotate %55 by %c1_i32_41 dim 0 : vector<16x128xf32>, i32 -> vector<16x128xf32>
    %c0_42 = arith.constant 0 : index
    %c0_43 = arith.constant 0 : index
    %57 = vector.load %arg11[%c0_42, %c0_43] : memref<16x128xf32, #tpu.memory_space<vmem>>, vector<16x128xf32>
    tpu.vector_store %arg11[%c0_42, %c0_43], %56 {strides = array<i32>} : memref<16x128xf32, #tpu.memory_space<vmem>>, vector<16x128xf32>,
    %c8_44 = arith.constant 8 : index
    %c0_45 = arith.constant 0 : index
    %58 = vector.load %arg11[%c8_44, %c0_45] : memref<16x128xf32, #tpu.memory_space<vmem>>, vector<8x128xf32>
    %59 = vector.extract_strided_slice %15 {offsets = [5, 0], sizes = [1, 128], strides = [1, 1]} : vector<8x128xf32> to vector<1x128xf32>
    %60 = vector.broadcast %59 : vector<1x128xf32> to vector<8x128xf32>
    %61 = arith.mulf %58, %60 : vector<8x128xf32>
    %62 = arith.addf %54, %61 : vector<8x128xf32>
    %c0_46 = arith.constant 0 : index
    %c0_47 = arith.constant 0 : index
    %63 = vector.load %arg11[%c0_46, %c0_47] : memref<16x128xf32, #tpu.memory_space<vmem>>, vector<16x128xf32>
    %c1_i32_48 = arith.constant 1 : i32
    %64 = tpu.dynamic_rotate %63 by %c1_i32_48 dim 0 : vector<16x128xf32>, i32 -> vector<16x128xf32>
    %c0_49 = arith.constant 0 : index
    %c0_50 = arith.constant 0 : index
    %65 = vector.load %arg11[%c0_49, %c0_50] : memref<16x128xf32, #tpu.memory_space<vmem>>, vector<16x128xf32>
    tpu.vector_store %arg11[%c0_49, %c0_50], %64 {strides = array<i32>} : memref<16x128xf32, #tpu.memory_space<vmem>>, vector<16x128xf32>,
    %c8_51 = arith.constant 8 : index
    %c0_52 = arith.constant 0 : index
    %66 = vector.load %arg11[%c8_51, %c0_52] : memref<16x128xf32, #tpu.memory_space<vmem>>, vector<8x128xf32>
    %67 = vector.extract_strided_slice %15 {offsets = [6, 0], sizes = [1, 128], strides = [1, 1]} : vector<8x128xf32> to vector<1x128xf32>
    %68 = vector.broadcast %67 : vector<1x128xf32> to vector<8x128xf32>
    %69 = arith.mulf %66, %68 : vector<8x128xf32>
    %70 = arith.addf %62, %69 : vector<8x128xf32>
    %c0_53 = arith.constant 0 : index
    %c0_54 = arith.constant 0 : index
    %71 = vector.load %arg11[%c0_53, %c0_54] : memref<16x128xf32, #tpu.memory_space<vmem>>, vector<16x128xf32>
    %c1_i32_55 = arith.constant 1 : i32
    %72 = tpu.dynamic_rotate %71 by %c1_i32_55 dim 0 : vector<16x128xf32>, i32 -> vector<16x128xf32>
    %c0_56 = arith.constant 0 : index
    %c0_57 = arith.constant 0 : index
    %73 = vector.load %arg11[%c0_56, %c0_57] : memref<16x128xf32, #tpu.memory_space<vmem>>, vector<16x128xf32>
    tpu.vector_store %arg11[%c0_56, %c0_57], %72 {strides = array<i32>} : memref<16x128xf32, #tpu.memory_space<vmem>>, vector<16x128xf32>,
    %c8_58 = arith.constant 8 : index
    %c0_59 = arith.constant 0 : index
    %74 = vector.load %arg11[%c8_58, %c0_59] : memref<16x128xf32, #tpu.memory_space<vmem>>, vector<8x128xf32>
    %75 = vector.extract_strided_slice %15 {offsets = [7, 0], sizes = [1, 128], strides = [1, 1]} : vector<8x128xf32> to vector<1x128xf32>
    %76 = vector.broadcast %75 : vector<1x128xf32> to vector<8x128xf32>
    %77 = arith.mulf %74, %76 : vector<8x128xf32>
    %78 = arith.addf %70, %77 : vector<8x128xf32>
    %c0_60 = arith.constant 0 : index
    %c0_61 = arith.constant 0 : index
    %79 = vector.load %arg10[%c0_60, %c0_61] : memref<8x128xf32, #tpu.memory_space<vmem>>, vector<8x128xf32>
    tpu.vector_store %arg10[%c0_60, %c0_61], %78 {strides = array<i32>} : memref<8x128xf32, #tpu.memory_space<vmem>>, vector<8x128xf32>,
    %c0_i32_62 = arith.constant 0 : i32
    %80 = arith.cmpi eq, %3, %c0_i32_62 : i32
    %81 = arith.extui %80 : i1 to i32
    %c0_i32_63 = arith.constant 0 : i32
    %82 = arith.cmpi ne, %81, %c0_i32_63 : i32
    scf.if %82 {
      %c0_64 = arith.constant 0 : index
      %c0_65 = arith.constant 0 : index
      %83 = vector.load %arg7[%c0_64, %c0_65] : memref<128x128xf32, #tpu.memory_space<vmem>>, vector<128x128xf32>
      %cst_66 = arith.constant dense<0.000000e+00> : vector<8x128xf32>
      %84 = tpu.matmul %8, %83, %cst_66 {dimension_numbers = #tpu.dot_dimension_numbers<[1], [0], [0], [1], [0, 0, 1, 1], [], []>} : vector<8x128xf32>, vector<128x128xf32>, vector<8x128xf32> -> vector<8x128xf32>
      %c0_67 = arith.constant 0 : index
      %c0_68 = arith.constant 0 : index
      %85 = vector.load %arg8[%c0_67, %c0_68] : memref<1x128xf32, #tpu.memory_space<vmem>>, vector<1x128xf32>
      %86 = vector.broadcast %85 : vector<1x128xf32> to vector<8x128xf32>
      %87 = arith.addf %84, %86 : vector<8x128xf32>
      %88 = arith.mulf %78, %87 : vector<8x128xf32>
      %89 = arith.addf %88, %8 : vector<8x128xf32>
      %c0_69 = arith.constant 0 : index
      %c0_70 = arith.constant 0 : index
      %c0_71 = arith.constant 0 : index
      %90 = vector.load %arg9[%c0_69, %c0_70, %c0_71] : memref<1x8x128xf32, #tpu.memory_space<vmem>>, vector<1x8x128xf32>
      %91 = vector.shape_cast %90 : vector<1x8x128xf32> to vector<8x128xf32>
      %92 = vector.shape_cast %89 : vector<8x128xf32> to vector<1x8x128xf32>
      tpu.vector_store %arg9[%c0_69, %c0_70, %c0_71], %92 {strides = array<i32>} : memref<1x8x128xf32, #tpu.memory_space<vmem>>, vector<1x8x128xf32>,
    } else {
    }
    return
  }
  func.func @transform_0(%arg0: i32, %arg1: i32, %arg2: memref<3xi32, #tpu.memory_space<smem>>, %arg3: memref<3xi32, #tpu.memory_space<smem>>) -> (i32, i32, i32) {
    %0 = arith.index_cast %arg1 : i32 to index
    %1 = memref.load %arg2[%0] : memref<3xi32, #tpu.memory_space<smem>>
    %2 = arith.index_cast %arg1 : i32 to index
    %3 = memref.load %arg3[%2] : memref<3xi32, #tpu.memory_space<smem>>
    %4 = arith.subi %1, %3 : i32
    %c0_i32 = arith.constant 0 : i32
    %c0_i32_0 = arith.constant 0 : i32
    return %arg0, %4, %c0_i32 : i32, i32, i32
  }
  func.func @transform_1(%arg0: i32, %arg1: i32, %arg2: memref<3xi32, #tpu.memory_space<smem>>, %arg3: memref<3xi32, #tpu.memory_space<smem>>) -> (i32, i32, i32) {
    %0 = arith.index_cast %arg1 : i32 to index
    %1 = memref.load %arg2[%0] : memref<3xi32, #tpu.memory_space<smem>>
    %2 = arith.index_cast %arg1 : i32 to index
    %3 = memref.load %arg3[%2] : memref<3xi32, #tpu.memory_space<smem>>
    %4 = arith.subi %1, %3 : i32
    %c1_i32 = arith.constant 1 : i32
    %5 = arith.subi %4, %c1_i32 : i32
    %c0_i32 = arith.constant 0 : i32
    %6 = arith.maxsi %5, %c0_i32 : i32
    %c0_i32_0 = arith.constant 0 : i32
    %c0_i32_1 = arith.constant 0 : i32
    return %arg0, %6, %c0_i32_0 : i32, i32, i32
  }
  func.func @transform_2(%arg0: i32, %arg1: i32, %arg2: memref<3xi32, #tpu.memory_space<smem>>, %arg3: memref<3xi32, #tpu.memory_space<smem>>) -> (i32, i32) {
    %0 = arith.index_cast %arg1 : i32 to index
    %1 = memref.load %arg3[%0] : memref<3xi32, #tpu.memory_space<smem>>
    %c0_i32 = arith.constant 0 : i32
    %c0_i32_0 = arith.constant 0 : i32
    return %1, %c0_i32 : i32, i32
  }
  func.func @transform_3(%arg0: i32, %arg1: i32, %arg2: memref<3xi32, #tpu.memory_space<smem>>, %arg3: memref<3xi32, #tpu.memory_space<smem>>) -> (i32, i32) {
    %c0_i32 = arith.constant 0 : i32
    %c0_i32_0 = arith.constant 0 : i32
    %c0_i32_1 = arith.constant 0 : i32
    return %c0_i32, %c0_i32_0 : i32, i32
  }
  func.func @transform_4(%arg0: i32, %arg1: i32, %arg2: memref<3xi32, #tpu.memory_space<smem>>, %arg3: memref<3xi32, #tpu.memory_space<smem>>) -> (i32, i32) {
    %c0_i32 = arith.constant 0 : i32
    %c0_i32_0 = arith.constant 0 : i32
    %c0_i32_1 = arith.constant 0 : i32
    return %c0_i32, %c0_i32_0 : i32, i32
  }
  func.func @transform_5(%arg0: i32, %arg1: i32, %arg2: memref<3xi32, #tpu.memory_space<smem>>, %arg3: memref<3xi32, #tpu.memory_space<smem>>) -> (i32, i32, i32) {
    %0 = arith.index_cast %arg1 : i32 to index
    %1 = memref.load %arg2[%0] : memref<3xi32, #tpu.memory_space<smem>>
    %c0_i32 = arith.constant 0 : i32
    %c0_i32_0 = arith.constant 0 : i32
    return %arg0, %1, %c0_i32 : i32, i32, i32
  }
}

</mosaic_0001>

<bundles_post_ra>
// kernel: implicit_conv_forward.2
= control target key start
LH: loop header
LB: loop body
LE: loop exit
PB: predicated region body
PF: predicated region fallthrough
CT: control target
= control target key end

     0   :  { %s526_s18 = smov 0   ;;  %s558_s0 = inlined_call_operand.vmem [shape: f32[16,3], index: 0, kind: input, shape index: {}]   ;;  %s559_s1 = inlined_call_operand.vmem [shape: f32[3,16], index: 1, kind: input, shape index: {}]   ;;  %s560_s2 = inlined_call_operand.vmem [shape: f32[1,16], index: 2, kind: input, shape index: {}]   ;;  %s561_s3 = inlined_call_operand.vmem [shape: f32[16,128], index: 3, kind: input, shape index: {}]   ;;  %s562_s4 = inlined_call_operand.vmem [shape: f32[1,128], index: 4, kind: input, shape index: {}]   ;;  %s563_s5 = inlined_call_operand.vmem [shape: f32[16,128], index: 5, kind: output, shape index: {}]  }
   0x1 LB: > { %s445_s19 = sadd.s32 4294967295, %s492_s18   ;;  %p449_p0 = scmp.ge.s32.totalorder %s492_s18, 1  ;;  %s492_s18 = sphi %s526_s18, %s15_s18  }
   0x2   : > { %p186_p1 = scmp.lt.s32.totalorder %s492_s18, 3 }
   0x4   : > { %p187_p2 = pnand %p449_p0, %p186_p1 }
   0x5   : > { %p212_p3 = scmp.lt.s32.totalorder (!%p187_p2), %s445_s19, 1 }
   0x6   : > { %190 = sbr.rel (%p187_p2) target bundleno = 408 (0x198), region = 40 }
   0xb   : > { %v221_v0 = vld [vmem:[%s559_s1] sm:$0x7]  ;;  %vm233_vm0 = vcmask 1042432   ;;  %v494_v1 = vmov 0.0   ;;  %vm495_vm1 = vmmov 0   ;;  %s565_s19 = smov (!%p212_p3, %s445_s19), 1 }
   0xc   : > { %464 = vmatprep.subr.mxu0 %v494_v1  ;;  %466 = vmatprep.mubr.msk.f32.mxu0 %vm495_vm1, %v494_v1  ;;  %s450_s22 = sshll.u32 %s565_s19, 3  ;;  %vm229_vm2 = vcmask 23552   ;;  %v309_v3 = vld [vmem:[%s561_s3 + $0x8] sm:$0xff]  ;;  %v308_v4 = vld [vmem:[%s561_s3] sm:$0xff]  ;;  %vm317_vm3 = vcmask 130048  }
   0xd   : > { %465 = vmatpush3.msk.msra.mxu0 %vm233_vm0, %v221_v0  ;;  %469 = vmatprep.subr.mxu1 %v494_v1  ;;  %s215_s25 = scalar_lea.vmem %s558_s0, %s450_s22  ;;  %v452_v5 = vld [vmem:[%s560_s2] ss:$0 sm:$0xff]  ;;  %s219_s11 = scalar_lea.vmem %s563_s5, %s450_s22 }
   0xe   : > { %473 = vmatprep.mubr.msk.f32.mxu1 %vm495_vm1, %v494_v1  ;;  %v220_v2 = vld [vmem:[%s215_s25] sm:$0xff]  ;;  %470 = vmatpush3.msra.mxu1 %v309_v3 }
   0xf   : > { %467 = vmatmul.mubr.msk.f32.vlgmr.msra.gmra.mxu0 %vm229_vm2, %v220_v2  ;;  %471 = vmatprep.subr.mxu1 %v494_v1  ;;  %v455_v10 = vld [vmem:[%s562_s4] ss:$0 sm:$0xff] }
  0x10   : > { %472 = vmatpush3.msra.mxu1 %v308_v4 }
  0xcf   : > { %v303_v6 = vpop.f32.mrf.mxu0 }
  0xd0   : > { %v304_v7 = vadd.f32 %v452_v5, %v303_v6 }
  0xd1   : > { %v468_v8 = vpop.f32.mrf.mxu0 }
  0xd2   : > { %v307_v9 = vmax.f32 %v304_v7, 0.0 }
  0xd4   : > { %474 = vmatmul.mubr.msk.f32.vlgmr.msra.gmra.mxu1 %vm317_vm3, %v307_v9 }
 0x194   : > { %v387_v11 = vpop.f32.mrf.mxu1 }
 0x195   : > { %v388_v12 = vadd.f32 %v455_v10, %v387_v11 }
 0x196   : > { %v475_v13 = vpop.f32.mrf.mxu1 }
 0x197   : > { %391 = vst [vmem:[%s219_s11] sm:$0xff] %v388_v12 }
 0x198 PF: > { %s15_s18 = sadd.s32 1, %s492_s18  }
 0x199   : > { %p12_p4 = scmp.ge.s32.totalorder %s15_s18, 4  }
 0x19b   :  { %14 = sbr.rel (!%p12_p4) target bundleno = 1 (0x1), region = 70 }

// kernel: implicit_conv_forward.3
= control target key start
LH: loop header
LB: loop body
LE: loop exit
PB: predicated region body
PF: predicated region fallthrough
CT: control target
= control target key end

     0   :  { %s1376_s0 = inlined_call_operand.vmem [shape: s32[3], index: 0, kind: input, shape index: {}]   ;;  %s1377_s2 = inlined_call_operand.vmem [shape: f32[2,16,128], index: 2, kind: input, shape index: {}, may-alias: {2,3}]   ;;  %s1378_s3 = inlined_call_operand.vmem [shape: f32[2,16,128], index: 3, kind: input, shape index: {}, may-alias: {2,3}]   ;;  %s1379_s4 = inlined_call_operand.vmem [shape: f32[16,128], index: 4, kind: input, shape index: {}]   ;;  %s1380_s5 = inlined_call_operand.hbm [shape: f32[128,128], index: 5, kind: input, shape index: {}]   ;;  %s1381_s6 = inlined_call_operand.vmem [shape: f32[1,128], index: 6, kind: input, shape index: {}]   ;;  %s1382_s7 = inlined_call_operand.hbm [shape: f32[2,16,128], index: 7, kind: output, shape index: {}]   ;;  %s1383_s1 = inlined_call_operand.vmem [shape: s32[3], index: 1, kind: input, shape index: {}]  }
   0x1   :  { %1391 = sst [smem:[#allocation22_spill]] %s1380_s5  ;;  %s12_s26 = sshll.u32 %s1376_s0, 4  ;;  %s13_s26 = int_to_ptr.vmem [resolvable:$true] %s12_s26 }
   0x2   :  { %s16_s29 = sshll.u32 %s1383_s1, 4  ;;  %s937_s30 = scalar_lea.vmem %s13_s26, 16  ;;  %s17_s29 = int_to_ptr.vmem [resolvable:$true] %s16_s29 }
   0x3   :  { %p938_p0 = scmp.ne.s32.totalorder %s13_s26, %s937_s30  ;;  %p942_p1 = scmp.lt.s32.totalorder %s13_s26, %s13_s26 }
   0x4   :  { %p943_p2 = scmp.lt.s32.totalorder %s937_s30, %s937_s30 }
   0x6   :  { %p944_p3 = por %p943_p2, %p942_p1 }
   0x8   :  { %p945_p4 = pnand %p944_p3, %p938_p0 }
   0xa   :  { %948 = shalt.err (!%p945_p4)  }
   0xb   :  { %s1087_s8 = smov [#allocation5]   ;;  %s949_s9 = scalar_lea.vmem %s17_s29, 16 }
   0xc   :  { %15 = dma.vmem_to_smem %s13_s26, 16, %s1087_s8, [#allocation4] }
   0xd   :  { %p950_p5 = scmp.ne.s32.totalorder %s17_s29, %s949_s9  ;;  %p954_p6 = scmp.lt.s32.totalorder %s17_s29, %s17_s29 }
   0xe   :  { %p955_p7 = scmp.lt.s32.totalorder %s949_s9, %s949_s9 }
  0x10   :  { %p956_p8 = por %p955_p7, %p954_p6 }
  0x12   :  { %p957_p9 = pnand %p956_p8, %p950_p5 }
  0x14   :  { %960 = shalt.err (!%p957_p9)  }
  0x15   :  { %s1088_s0 = smov [#allocation6]  }
  0x16   :  { %19 = dma.vmem_to_smem %s17_s29, 16, %s1088_s0, [#allocation4] }
  0x17   :  { %1045 = dma.done.wait [#allocation4], 32 }
  0x18   :  { %1046 = vsyncadd [#allocation4], 4294967264 }
  0x19   :  { %21 = sfence }
  0x1a   :  { %22 = vsyncpa [#allocation8], 0 }
  0x1b   :  { %23 = vsyncpa [#allocation9], 0 }
  0x1c   :  { %25 = vsyncpa [#allocation9 + $0x1], 0  ;;  %s1142_s1 = smov 0   ;;  %s1144_s10 = smov 0  }
  0x1d   :  { %s1146_s11 = smov 0   ;;  %s1148_s12 = smov 0  }
  0x1e   :  { %s1150_s13 = smov 0   ;;  %s1152_s14 = smov 0  }
  0x1f   :  { %s1154_s15 = smov 0   ;;  %s1156_s16 = smov 0  }
  0x20 LB: > { %1392 = sst [smem:[#allocation15_spill]] %s1065_s11  ;;  %s760_s17 = sadd.s32 4294967295, %s1085_s16   ;;  %s1085_s16 = sphi %s1156_s16, %s31_s16   ;;  %s1081_s15 = sphi %s1154_s15, %s1412_s15   ;;  %s1077_s14 = sphi %s1152_s14, %s1411_s14   ;;  %s1073_s13 = sphi %s1150_s13, %s1410_s13   ;;  %s1069_s12 = sphi %s1148_s12, %s1409_s12   ;;  %s1065_s11 = sphi %s1146_s11, %s1408_s11   ;;  %s1061_s10 = sphi %s1144_s10, %s1414_s10   ;;  %s1057_s1 = sphi %s1142_s1, %s1413_s1  }
  0x21   : > { %1393 = sst [smem:[#allocation16_spill]] %s1077_s14  ;;  %s761_s18 = sadd.s32 4294967294, %s1085_s16  }
  0x22   : > { %1394 = sst [smem:[#allocation17_spill]] %s1081_s15  ;;  %s40_s19 = sadd.s32 1, %s1077_s14 }
  0x23   : > { %s43_s20 = sadd.s32 1, %s1081_s15  ;;  %p41_p10 = scmp.ge.s32.totalorder %s40_s19, 3 }
  0x24   : > { %s191_s21 = sld [smem:[#allocation5 + %s1077_s14]]  ;;  %s198_s22 = sadd.s32 1, %s1065_s11 }
  0x25   : > { %p208_p11 = scmp.ne.s32.totalorder %s1065_s11, %s1061_s10  ;;  %s1416_s19 = smov (%p41_p10, %s40_s19), 0 }
  0x26   : > { %1395 = sst [smem:[#allocation18_spill]] %s1416_s19  ;;  %s1418_s20 = smov (!%p41_p10, %s43_s20), %s1081_s15 }
  0x27   : > { %s192_s23 = sld [smem:[#allocation5 + %s1416_s19]]  ;;  %p209_p12 = scmp.eq.s32.totalorder %s760_s17, 5 }
  0x28   : > { %p45_p13 = scmp.ge.s32.totalorder %s1418_s20, 2  ;;  %p214_p0 = scmp.ne.s32.totalorder %s1061_s10, %s1057_s1 }
  0x29   : > { %p1196_p1 = por %p209_p12, %p208_p11  ;;  %p215_p2 = scmp.eq.s32.totalorder %s761_s18, 5 }
  0x2a   : > { %s1420_s20 = smov (%p45_p13, %s1418_s20), 0  ;;  %p764_p4 = scmp.ge.s32.totalorder %s1085_s16, 1 }
  0x2b   : > { %1397 = sst [smem:[#allocation19_spill]] %s1420_s20  ;;  %p1202_p3 = por %p215_p2, %p214_p0 }
  0x2c   : > { %s193_s26 = ssub.s32 %s1081_s15, %s1420_s20  ;;  %p222_p5 = scmp.lt.s32.totalorder %s1085_s16, 7 }
  0x2d   : > { %s1398_s25 = scalar_select %p1202_p3, 1, 0 }
  0x2e   : > { %s194_s27 = ssub.s32 %s191_s21, %s192_s23  ;;  %p1210_p6 = pnand %p764_p4, %p222_p5 }
  0x2f   : > { %1399 = sst [smem:[#allocation20_spill]] %s1398_s25  ;;  %s195_s28 = sor.u32 %s194_s27, %s193_s26 }
  0x30   : > { %p196_p7 = scmp.eq.s32.totalorder %s195_s28, 0  ;;  %p1214_p8 = scmp.eq.s32.totalorder %s760_s17, 0 }
  0x31   : > { %p851_p9 = pneg %p1210_p6  ;;  %s1089_s9 = smov [#allocation7]  }
  0x32   : > { %s1221_s8 = scalar_select %p196_p7, %s1065_s11, %s198_s22  }
  0x33   : > { %s234_s0 = sshll.u32 %s1089_s9, 4  ;;  %p1225_p10 = pnand %p1214_p8, %p851_p9  ;;  %s235_s0 = int_to_ptr.vmem [resolvable:$true] %s234_s0 }
  0x34   : > { %1402 = sst [smem:[#allocation21_spill]] %s1221_s8  ;;  %s972_s17 = scalar_lea.vmem %s235_s0, 2048 }
  0x35   : > { %p963_p11 = pneg %p1225_p10  ;;  %p973_p12 = scmp.ne.s32.totalorder %s235_s0, %s972_s17 }
  0x36   : > { %p980_p2 = scmp.lt.s32.totalorder %s235_s0, %s235_s0  ;;  %p981_p4 = scmp.lt.s32.totalorder %s972_s17, %s972_s17 }
  0x37   : > { %p975_p13 = pnand %p973_p12, %p963_p11 }
  0x38   : > { %p982_p5 = por %p981_p4, %p980_p2 }
  0x39   : > { %p976_p0 = pneg %p975_p13 }
  0x3b   : > { %p983_p7 = pnand %p982_p5, %p976_p0 }
  0x3d   : > { %986 = shalt.err (!%p983_p7)
}
  0x3e   : > { %s1090_s21 = smov 128   ;;  %s1091_s22 = smov 8  }
  0x3f   : > { %s1404_s5 = sld [smem:[#allocation22_spill]] }
  0x41   : > { %302 = sbr.rel (%p1210_p6) target bundleno = 390 (0x186), region = 40 }
  0x45   : > { %854 = dma.hbm_to_vmem [thread:$0]  (!%p1225_p10), %s1404_s5, 2048, %s235_s0, [#allocation8], %s1090_s21, %s1090_s21, %s1091_s22  }
  0x46   : > { %1048 = dma.done.wait (%p1214_p8), [#allocation8], 2048  }
  0x47   : > { %1050 = vsyncadd (%p1214_p8), [#allocation8], 4294965248  ;;  %p358_p9 = scmp.lt.s32.totalorder %s1073_s13, 1  ;;  %s1386_s27 = sand.u32 1, %s1061_s10  }
  0x48   : > { %s355_s28 = sld [smem:[#allocation5 + %s1069_s12]]  ;;  %s1247_s29 = sshll.u32 %s1386_s27, 3 }
  0x49   : > { %s356_s9 = sld [smem:[#allocation6 + %s1069_s12]] }
  0x4a   : > { %s359_s30 = scalar_select %p358_p9, %s1073_s13, 1 }
  0x4b   : > { %s369_s0 = sld [smem:[#allocation5 + %s1069_s12]] }
  0x4c   : > { %s370_s18 = sld [smem:[#allocation6 + %s1069_s12]]  ;;  %s770_s26 = sshll.u32 %s359_s30, 1 }
  0x4d   : > { %s389_s17 = sld [smem:[#allocation6 + %s1069_s12]] }
  0x4e   : > { %s1255_s21 = sld [smem:[#allocation5 + %s1069_s12]] }
  0x4f   : > { %s357_s22 = ssub.s32 %s355_s28, %s356_s9  ;;  %s1258_s23 = sld [smem:[#allocation6 + %s1069_s12]] }
  0x50   : > { %p360_p6 = scmp.lt.s32.totalorder %s357_s22, 1 }
  0x52   : > { %s1422_s22 = smov (!%p360_p6, %s357_s22), 1  ;;  %s371_s5 = ssub.s32 %s369_s0, %s370_s18 }
  0x53   : > { %p390_p8 = scmp.lt.s32.totalorder %s389_s17, 1  ;;  %s363_s20 = sadd.s32 %s770_s26, %s1422_s22 }
  0x54   : > { %s772_s19 = sadd.s32 4294967295, %s371_s5  ;;  %s771_s27 = sshll.u32 %s363_s20, 3 }
  0x55   : > { %p373_p10 = scmp.gt.s32.totalorder %s772_s19, 0  ;;  %s365_s8 = scalar_lea.vmem %s1377_s2, %s771_s27 }
  0x56   : > { %p773_p11 = scmp.lt.s32.totalorder %s772_s19, 1  ;;  %s1426_s17 = smov (!%p390_p8, %s389_s17), 1 }
  0x57   : > { %s1424_s19 = smov (!%p373_p10, %s772_s19), 0  ;;  %s780_s28 = sshll.u32 %s1426_s17, 3 }
  0x58   : > { %s1428_s19 = smov (!%p773_p11, %s1424_s19), 1  ;;  %s393_s0 = scalar_lea.vmem %s1379_s4, %s780_s28 }
  0x59   : > { %s380_s9 = sadd.s32 %s1428_s19, %s770_s26  ;;  %s354_s20 = scalar_lea.vmem [#allocation10], %s1247_s29 }
  0x5a   : > { %s779_s18 = sshll.u32 %s380_s9, 3  ;;  %p781_p12 = scmp.ne.s32.totalorder %s1258_s23, %s1255_s21 }
  0x5b   : > { %s382_s5 = scalar_lea.vmem %s1378_s3, %s779_s18 }
  0x5c   : > { %401 = sbr.rel (%p781_p12) target bundleno = 99 (0x63), region = 48 }
  0x61   : > { %v1092_v0 = vmov 0.0  }
  0x62   : > { %402 = vst [vmem:[#allocation2] sm:$0xff] %v1092_v0 }
  0x63 PF: > { %p404_p13 = scmp.lt.s32.totalorder %s1258_s23, %s1255_s21  ;;  %v415_v1 = vlaneseq  ;;  %v410_v3 = vld [vmem:[%s393_s0] sm:$0xff]  ;;  %p782_p0 = scmp.ne.s32.totalorder %s1258_s23, 0 }
  0x64   : > { %v1276_v4 = vld [vmem:[%s365_s8] sm:$0xff] }
  0x65   : > { %v1274_v2 = vshrl.u32 %v415_v1, 7  ;;  %s935_s11 = scalar_select %p404_p13, 255, 0  ;;  %v423_v9 = vrot.slane %v1276_v4, 7 }
  0x67   : > { %v417_v5 = vsub.s32 0, %v1274_v2  ;;  %v434_v6 = vsub.s32 1, %v1274_v2  ;;  %v448_v10 = vsub.s32 2, %v1274_v2  ;;  %v936_v11 = vld [vmem:[%s382_s5] sm:%s935_s11]  ;;  %vm426_vm0 = vcmp.lt.s32.totalorder %v1274_v2, 1 }
  0x68   : > { %v422_v14 = vrot.slane %v936_v11, 7  ;;  %v462_v16 = vsub.s32 3, %v1274_v2  ;;  %v476_v23 = vsub.s32 4, %v1274_v2  ;;  %v490_v31 = vsub.s32 5, %v1274_v2 }
  0x69   : > { %v418_v7 = vrot.slane %v410_v3, %v417_v5  ;;  %v411_v8 = vld [vmem:[#allocation2] sm:$0xff]  ;;  %v435_v13 = vrot.slane %v410_v3, %v434_v6  ;;  %v449_v19 = vrot.slane %v410_v3, %v448_v10  ;;  %v504_v39 = vsub.s32 6, %v1274_v2 }
  0x6a   : > { %v427_v17 = vsel %vm426_vm0, %v422_v14, %v423_v9  ;;  %v428_v18 = vsel %vm426_vm0, %v423_v9, %v422_v14  ;;  %v463_v27 = vrot.slane %v410_v3, %v462_v16  ;;  %v477_v35 = vrot.slane %v410_v3, %v476_v23 }
  0x6b   : > { %v419_v12 = vmul.f32 %v418_v7, %v1276_v4  ;;  %v436_v20 = vmul.f32 %v435_v13, %v427_v17  ;;  %v439_v21 = vrot.slane %v428_v18, 7  ;;  %v440_v22 = vrot.slane %v427_v17, 7 }
  0x6c   : > { %v491_v43 = vrot.slane %v410_v3, %v490_v31  ;;  %v518_v47 = vsub.s32 7, %v1274_v2  ;;  %v505_v51 = vrot.slane %v410_v3, %v504_v39 }
  0x6d   : > { %v420_v15 = vadd.f32 %v419_v12, %v411_v8  ;;  %v441_v25 = vsel %vm426_vm0, %v439_v21, %v440_v22  ;;  %v442_v26 = vsel %vm426_vm0, %v440_v22, %v439_v21 }
  0x6e   : > { %v450_v28 = vmul.f32 %v449_v19, %v441_v25  ;;  %v453_v29 = vrot.slane %v442_v26, 7  ;;  %v454_v30 = vrot.slane %v441_v25, 7  ;;  %v519_v58 = vrot.slane %v410_v3, %v518_v47 }
  0x6f   : > { %v437_v24 = vadd.f32 %v436_v20, %v420_v15 }
  0x70   : > { %v455_v33 = vsel %vm426_vm0, %v453_v29, %v454_v30  ;;  %v456_v34 = vsel %vm426_vm0, %v454_v30, %v453_v29 }
  0x71   : > { %v451_v32 = vadd.f32 %v450_v28, %v437_v24  ;;  %v464_v36 = vmul.f32 %v463_v27, %v455_v33  ;;  %v467_v37 = vrot.slane %v456_v34, 7  ;;  %v468_v38 = vrot.slane %v455_v33, 7 }
  0x73   : > { %v465_v40 = vadd.f32 %v464_v36, %v451_v32  ;;  %v469_v41 = vsel %vm426_vm0, %v467_v37, %v468_v38  ;;  %v470_v42 = vsel %vm426_vm0, %v468_v38, %v467_v37 }
  0x74   : > { %v478_v44 = vmul.f32 %v477_v35, %v469_v41  ;;  %v481_v45 = vrot.slane %v470_v42, 7  ;;  %v482_v46 = vrot.slane %v469_v41, 7 }
  0x76   : > { %v479_v48 = vadd.f32 %v478_v44, %v465_v40  ;;  %v483_v49 = vsel %vm426_vm0, %v481_v45, %v482_v46  ;;  %v484_v50 = vsel %vm426_vm0, %v482_v46, %v481_v45 }
  0x77   : > { %v492_v52 = vmul.f32 %v491_v43, %v483_v49  ;;  %v495_v53 = vrot.slane %v484_v50, 7  ;;  %v496_v54 = vrot.slane %v483_v49, 7 }
  0x79   : > { %v493_v55 = vadd.f32 %v492_v52, %v479_v48  ;;  %v497_v56 = vsel %vm426_vm0, %v495_v53, %v496_v54  ;;  %v498_v57 = vsel %vm426_vm0, %v496_v54, %v495_v53 }
  0x7a   : > { %v506_v59 = vmul.f32 %v505_v51, %v497_v56  ;;  %v509_v60 = vrot.slane %v498_v57, 7  ;;  %v510_v61 = vrot.slane %v497_v56, 7 }
  0x7c   : > { %v507_v62 = vadd.f32 %v506_v59, %v493_v55  ;;  %v511_v63 = vsel %vm426_vm0, %v509_v60, %v510_v61 }
  0x7d   : > { %v520_v0 = vmul.f32 %v519_v58, %v511_v63  ;;  %526 = sbr.rel (%p782_p0) target bundleno = 363 (0x16b), region = 52 }
  0x7f   : > { %v521_v1 = vadd.f32 %v520_v0, %v507_v62 }
  0x81   : > { %522 = vst [vmem:[#allocation2] sm:$0xff] %v521_v1 }
  0x82   : > { %v542_v5 = vld [vmem:[#allocation7 + $0x78] sm:$0xff]  ;;  %v1093_v6 = vmov 0.0   ;;  %v541_v7 = vld [vmem:[#allocation7 + $0x70] sm:$0xff]  ;;  %vm1094_vm1 = vmmov 0   ;;  %v540_v3 = vld [vmem:[#allocation7 + $0x68] sm:$0xff] }
  0x83   : > { %808 = vmatprep.subr.mxu0 %v1093_v6  ;;  %840 = vmatprep.mubr.msk.f32.mxu0 %vm1094_vm1, %v1093_v6  ;;  %v539_v8 = vld [vmem:[#allocation7 + $0x60] sm:$0xff]  ;;  %v538_v2 = vld [vmem:[#allocation7 + $0x58] sm:$0xff]  ;;  %v537_v9 = vld [vmem:[#allocation7 + $0x50] sm:$0xff] }
  0x84   : > { %809 = vmatpush3.msra.mxu0 %v542_v5  ;;  %v536_v10 = vld [vmem:[#allocation7 + $0x48] sm:$0xff]  ;;  %v535_v11 = vld [vmem:[#allocation7 + $0x40] sm:$0xff]  ;;  %v534_v12 = vld [vmem:[#allocation7 + $0x38] sm:$0xff] }
  0x85   : > { %810 = vmatprep.subr.mxu0 %v1093_v6  ;;  %v533_v13 = vld [vmem:[#allocation7 + $0x30] sm:$0xff]  ;;  %v532_v14 = vld [vmem:[#allocation7 + $0x28] sm:$0xff]  ;;  %v531_v15 = vld [vmem:[#allocation7 + $0x20] sm:$0xff] }
  0x86   : > { %811 = vmatpush3.msra.mxu0 %v541_v7  ;;  %v530_v16 = vld [vmem:[#allocation7 + $0x18] sm:$0xff]  ;;  %v529_v17 = vld [vmem:[#allocation7 + $0x10] sm:$0xff]  ;;  %v528_v18 = vld [vmem:[#allocation7 + $0x8] sm:$0xff] }
  0x87   : > { %812 = vmatprep.subr.mxu0 %v1093_v6  ;;  %v527_v19 = vld [vmem:[#allocation7] sm:$0xff]  ;;  %v783_v20 = vld [vmem:[%s1381_s6] ss:$0 sm:$0xff] }
  0x88   : > { %813 = vmatpush3.msra.mxu0 %v540_v3 }
  0x89   : > { %814 = vmatprep.subr.mxu0 %v1093_v6 }
  0x8a   : > { %815 = vmatpush3.msra.mxu0 %v539_v8 }
  0x8b   : > { %816 = vmatprep.subr.mxu0 %v1093_v6 }
  0x8c   : > { %817 = vmatpush3.msra.mxu0 %v538_v2 }
  0x8d   : > { %818 = vmatprep.subr.mxu0 %v1093_v6 }
  0x8e   : > { %819 = vmatpush3.msra.mxu0 %v537_v9 }
  0x8f   : > { %820 = vmatprep.subr.mxu0 %v1093_v6 }
  0x90   : > { %821 = vmatpush3.msra.mxu0 %v536_v10 }
  0x91   : > { %822 = vmatprep.subr.mxu0 %v1093_v6 }
  0x92   : > { %823 = vmatpush3.msra.mxu0 %v535_v11 }
  0x93   : > { %824 = vmatprep.subr.mxu0 %v1093_v6 }
  0x94   : > { %825 = vmatpush3.msra.mxu0 %v534_v12 }
  0x95   : > { %826 = vmatprep.subr.mxu0 %v1093_v6 }
  0x96   : > { %827 = vmatpush3.msra.mxu0 %v533_v13 }
  0x97   : > { %828 = vmatprep.subr.mxu0 %v1093_v6 }
  0x98   : > { %829 = vmatpush3.msra.mxu0 %v532_v14 }
  0x99   : > { %830 = vmatprep.subr.mxu0 %v1093_v6 }
  0x9a   : > { %831 = vmatpush3.msra.mxu0 %v531_v15 }
  0x9b   : > { %832 = vmatprep.subr.mxu0 %v1093_v6 }
  0x9c   : > { %833 = vmatpush3.msra.mxu0 %v530_v16 }
  0x9d   : > { %834 = vmatprep.subr.mxu0 %v1093_v6 }
  0x9e   : > { %835 = vmatpush3.msra.mxu0 %v529_v17 }
  0x9f   : > { %836 = vmatprep.subr.mxu0 %v1093_v6 }
  0xa0   : > { %837 = vmatpush3.msra.mxu0 %v528_v18 }
  0xa1   : > { %838 = vmatprep.subr.mxu0 %v1093_v6 }
  0xa2   : > { %839 = vmatpush3.msra.mxu0 %v527_v19 }
  0xa3   : > { %841 = vmatmul.mubr.f32.vlgmr.msra.gmra.mxu0 %v1276_v4 }
 0x163   : > { %v616_v21 = vpop.f32.mrf.mxu0 }
 0x164   : > { %v617_v22 = vadd.f32 %v783_v20, %v616_v21 }
 0x165   : > { %v842_v23 = vpop.f32.mrf.mxu0 }
 0x166   : > { %v620_v24 = vmul.f32 %v617_v22, %v521_v1 }
 0x168   : > { %v621_v25 = vadd.f32 %v620_v24, %v1276_v4 }
 0x16a   : > { %622 = vst [vmem:[%s354_s20] sm:$0xff] %v621_v25 }
 0x16b PF: > { %s847_s19 = scalar_select %p1196_p1, [#allocation5], [#allocation11] }
 0x16c   : > { %s1430_s12 = smov (!%p1196_p1, %s1069_s12), 0  ;;  %s785_s8 = sshll.u32 %s1073_s13, 1 }
 0x16d   : > { %s631_s25 = sld [smem:[%s847_s19 + %s1430_s12]]  ;;  %s640_s27 = sshll.u32 %s354_s20, 4  ;;  %s641_s27 = int_to_ptr.vmem [resolvable:$true] %s640_s27 }
 0x16e   : > { %s1405_s9 = sand.u32 1, %s1061_s10   ;;  %s987_s0 = scalar_lea.vmem %s641_s27, 128 }
 0x16f   : > { %s624_s30 = scalar_lea.sflag [#allocation9], %s1405_s9  ;;  %p988_p2 = scmp.ne.s32.totalorder %s641_s27, %s987_s0 }
 0x170   : > { %s1095_s18 = smov [#allocation10]  }
 0x171   : > { %p989_p4 = pnand %p988_p2, %p1196_p1  ;;  %s991_s22 = sshll.u32 %s1095_s18, 4  ;;  %s992_s22 = int_to_ptr.vmem [resolvable:$false] %s991_s22 }
 0x172   : > { %s993_s12 = scalar_lea.vmem %s992_s22, 256  ;;  %p994_p7 = scmp.lt.s32.totalorder %s641_s27, %s992_s22 }
 0x173   : > { %s636_s17 = sadd.s32 %s785_s8, %s631_s25  ;;  %p990_p5 = pneg %p989_p4 }
 0x174   : > { %s786_s21 = sshll.u32 %s636_s17, 7  ;;  %p995_p9 = scmp.lt.s32.totalorder %s993_s12, %s987_s0 }
 0x175   : > { %s638_s28 = scalar_lea.hbm %s1382_s7, %s786_s21 }
 0x176   : > { %p996_p6 = por %p995_p9, %p994_p7 }
 0x178   : > { %p997_p8 = pnand %p996_p6, %p990_p5 }
 0x17a   : > { %1000 = shalt.err (!%p997_p8)
}
 0x17b   : > { %s1001_s13 = scalar_lea.hbm %s638_s28, 128  ;;  %s1005_s20 = scalar_lea.hbm %s1382_s7, 512 }
 0x17c   : > { %p1002_p10 = scmp.ne.s32.totalorder %s638_s28, %s1001_s13  ;;  %p1006_p13 = scmp.lt.s32.totalorder %s638_s28, %s1382_s7 }
 0x17d   : > { %p1007_p0 = scmp.lt.s32.totalorder %s1005_s20, %s1001_s13 }
 0x17e   : > { %p1003_p11 = pnand %p1002_p10, %p1196_p1 }
 0x17f   : > { %p1008_p2 = por %p1007_p0, %p1006_p13 }
 0x180   : > { %p1004_p12 = pneg %p1003_p11 }
 0x182   : > { %p1009_p4 = pnand %p1008_p2, %p1004_p12 }
 0x184   : > { %1012 = shalt.err (!%p1009_p4)
}
 0x185   : > { %849 = dma.vmem_to_hbm [thread:$0]  (%p1196_p1), %s641_s27, 128, %s638_s28, %s624_s30  }
 0x186 PF: > { %p861_p5 = scmp.ge.s32.totalorder %s1085_s16, 2  ;;  %s652_s19 = sand.u32 1, %s1057_s1  }
 0x187   : > { %s653_s25 = scalar_lea.sflag [#allocation9], %s652_s19 }
 0x188   : > { %p856_p7 = pnand %p861_p5, %p1202_p3 }
 0x18a   : > { %p857_p9 = pneg %p856_p7 }
 0x18c   : > { %1052 = dma.done.wait (%p857_p9), %s653_s25, 128  }
 0x18d   : > { %1054 = vsyncadd (%p857_p9), %s653_s25, 4294967168  ;;  %s31_s16 = sadd.s32 1, %s1085_s16   ;;  %s1407_s8 = sld [smem:[#allocation15_spill]] }
 0x18e   : > { %p28_p6 = scmp.ge.s32.totalorder %s31_s16, 8   ;;  %s1408_s11 = sld [smem:[#allocation21_spill]] }
 0x18f   : > { %s1409_s12 = sld [smem:[#allocation16_spill]]  ;;  %s1413_s1 = smov %s1061_s10 }
 0x190   : > { %s1410_s13 = sld [smem:[#allocation17_spill]]  ;;  %30 = sbr.rel (!%p28_p6) target bundleno = 32 (0x20), region = 94 }
 0x191   : > { %s1411_s14 = sld [smem:[#allocation18_spill]] }
 0x192   : > { %s1412_s15 = sld [smem:[#allocation19_spill]] }
 0x193   : > { %s1414_s10 = smov %s1407_s8 }
 0x195   :  { %658 = vsyncpa [#allocation8], 1 }
 0x196   :  { %660 = vsyncpa [#allocation8 + $0x1], 1 }
 0x197   :  { %661 = vsyncpa [#allocation9], 1 }
 0x198   :  { %663 = vsyncpa [#allocation9 + $0x1], 1 }

</bundles_post_ra>
